<compile_context>
chip_gen: v5e
topology: v5e:2x2
jax: 0.10.0
libtpu: 0.0.40
codegen_flags: <defaults>
</compile_context>

<pallas_src>
import functools

import jax
import jax.numpy as jnp
from jax.experimental import pallas as pl
from jax.experimental.pallas import tpu as pltpu

_LANE = 128


def _make_project_kernel(eps: float):
    def kernel(p_ref, pts_ref, out_ref):
        # p_ref:   SMEM (1, 3, 4)            per-batch projection matrix P
        #          (rows 0/1 pre-scaled by 2/(W-1), 2/(H-1) in the wrapper)
        # pts_ref: VMEM (1, 4, R_TILE, 128)  homogeneous 3D points, dense tiles
        # out_ref: VMEM (1, 2, R_TILE, 128)  normalized pixel coords
        x = pts_ref[0, 0, :, :]              # (R_TILE, 128), full vregs
        y = pts_ref[0, 1, :, :]
        z = pts_ref[0, 2, :, :]
        w = pts_ref[0, 3, :, :]

        def proj_row(i):
            # scalar (SMEM) * dense vector tiles on the VPU
            return (p_ref[0, i, 0] * x + p_ref[0, i, 1] * y
                    + p_ref[0, i, 2] * z + p_ref[0, i, 3] * w)

        cam_x = proj_row(0)                  # already scaled by 2/(W-1)
        cam_y = proj_row(1)                  # already scaled by 2/(H-1)
        cam_z = proj_row(2)                  # unscaled depth row

        d = cam_z + eps
        r = pl.reciprocal(d, approx=True)    # EUP, VALU slot stays free
        r = r * (2.0 - d * r)                # one Newton step -> full f32 acc

        out_ref[0, 0, :, :] = cam_x * r - 1.0
        out_ref[0, 1, :, :] = cam_y * r - 1.0

    return kernel


@functools.partial(jax.jit, static_argnames=("height", "width", "eps"))
def project_3d(points, K, T, *, height, width, eps=1e-7):
    """Pallas implementation of Project3D.forward.

    points: [B, 4, H*W] float32  (homogeneous 3D points)
    K, T:   [B, 4, 4]   float32
    returns [B, H, W, 2] float32
    """
    B, C, N = points.shape
    assert C == 4 and N == height * width
    assert height > 1 and width > 1, "normalization divides by (dim - 1)"

    points = points.astype(jnp.float32)

    # Tiny [B,4,4] matmul stays in plain JAX; fold the pixel normalization
    # into P rows 0/1 so the kernel saves 2 vector muls per point.
    P = jnp.matmul(K.astype(jnp.float32), T.astype(jnp.float32))[:, :3, :]
    scale = jnp.array([2.0 / (width - 1), 2.0 / (height - 1), 1.0],
                      dtype=jnp.float32)
    P = P * scale[None, :, None]                                   # [B, 3, 4]

    # Dense (sublane, lane) view of the pixel dimension, tiled over rows.
    n_rows = -(-N // _LANE)
    r_tile = min(512, ((n_rows + 7) // 8) * 8)        # multiple of 8 sublanes
    n_rows_pad = ((n_rows + r_tile - 1) // r_tile) * r_tile
    n_pad = n_rows_pad * _LANE
    num_tiles = n_rows_pad // r_tile

    if n_pad != N:
        points = jnp.pad(points, ((0, 0), (0, 0), (0, n_pad - N)))
    pts4 = points.reshape(B, 4, n_rows_pad, _LANE)    # layout-preserving

    kernel = _make_project_kernel(float(eps))

    out = pl.pallas_call(
        kernel,
        out_shape=jax.ShapeDtypeStruct((B, 2, n_rows_pad, _LANE), jnp.float32),
        grid_spec=pltpu.PrefetchScalarGridSpec(
            num_scalar_prefetch=0,
            grid=(B, num_tiles),
            in_specs=[
                pl.BlockSpec((1, 3, 4), lambda b, n: (b, 0, 0),
                             memory_space=pltpu.MemorySpace.SMEM),
                pl.BlockSpec((1, 4, r_tile, _LANE), lambda b, n: (b, 0, n, 0)),
            ],
            out_specs=pl.BlockSpec((1, 2, r_tile, _LANE),
                                   lambda b, n: (b, 0, n, 0)),
        ),
        compiler_params=pltpu.CompilerParams(
            dimension_semantics=("parallel", "parallel")),
    )(P, pts4)

    # [B, 2, n_pad] -> drop padding -> [B, 2, H, W] -> [B, H, W, 2]
    pix = out.reshape(B, 2, n_pad)[:, :, :N].reshape(B, 2, height, width)
    return pix.transpose(0, 2, 3, 1)


def project_3d_ref(points, K, T, *, height, width, eps=1e-7):
    """Plain-JAX reference matching the PyTorch module exactly."""
    B = points.shape[0]
    P = jnp.matmul(K, T)[:, :3, :]
    cam = jnp.matmul(P, points)
    pix = cam[:, :2, :] / (cam[:, 2:3, :] + eps)
    pix = pix.reshape(B, 2, height, width).transpose(0, 2, 3, 1)
    denom = jnp.array([width - 1, height - 1], dtype=pix.dtype)
    pix = pix / denom
    return (pix - 0.5) * 2.0


if __name__ == "__main__":
    B, H, W = 2, 16, 16
    N = H * W

    key = jax.random.PRNGKey(0)
    k_xy, k_z, k_t = jax.random.split(key, 3)

    # Homogeneous 3D points with depth safely away from zero.
    xy = jax.random.normal(k_xy, (B, 2, N), dtype=jnp.float32)
    z = jax.random.uniform(k_z, (B, 1, N), minval=1.0, maxval=3.0,
                           dtype=jnp.float32)
    ones = jnp.ones((B, 1, N), dtype=jnp.float32)
    points = jnp.concatenate([xy, z, ones], axis=1)              # [B, 4, N]

    # Deterministic pinhole intrinsics K and rigid transform T.
    K_single = jnp.array([[W / 2.0, 0.0, W / 2.0, 0.0],
                          [0.0, H / 2.0, H / 2.0, 0.0],
                          [0.0, 0.0, 1.0, 0.0],
                          [0.0, 0.0, 0.0, 1.0]], dtype=jnp.float32)
    K = jnp.broadcast_to(K_single, (B, 4, 4))

    trans = 0.1 * jax.random.normal(k_t, (B, 3), dtype=jnp.float32)
    T = jnp.broadcast_to(jnp.eye(4, dtype=jnp.float32), (B, 4, 4))
    T = T.at[:, :3, 3].set(trans)

    out = project_3d(points, K, T, height=H, width=W, eps=1e-7)
    out = jax.block_until_ready(out)

    ref = project_3d_ref(points, K, T, height=H, width=W, eps=1e-7)
    assert out.shape == (B, H, W, 2), out.shape
    assert jnp.allclose(out, ref, atol=1e-4, rtol=1e-4), (
        float(jnp.max(jnp.abs(out - ref))))

    print("KERNEL_OK")
</pallas_src>

<mosaic_0001>
module attributes {stable_mosaic.version = 11 : i64} {
  func.func @kernel(%arg0: i32, %arg1: i32, %arg2: memref<1x3x4xf32, #tpu.memory_space<smem>>, %arg3: memref<1x4x8x128xf32, #tpu.memory_space<vmem>>, %arg4: memref<1x2x8x128xf32, #tpu.memory_space<vmem>>) attributes {dimension_semantics = [#tpu.dimension_semantics<parallel>, #tpu.dimension_semantics<parallel>], iteration_bounds = array<i64: 2, 1>, scalar_prefetch = 0 : i64, scratch_operands = 0 : i64, tpu.core_type = #tpu.core_type<tc>, window_params = [{transform_indices = @transform_0, window_bounds = array<i64: 1, 3, 4>}, {transform_indices = @transform_1, window_bounds = array<i64: 1, 4, 8, 128>}, {transform_indices = @transform_2, window_bounds = array<i64: 1, 2, 8, 128>}]} {
    %c0 = arith.constant 0 : index
    %c0_0 = arith.constant 0 : index
    %c0_1 = arith.constant 0 : index
    %c0_2 = arith.constant 0 : index
    %0 = vector.load %arg3[%c0, %c0_0, %c0_1, %c0_2] : memref<1x4x8x128xf32, #tpu.memory_space<vmem>>, vector<1x1x8x128xf32>
    %1 = vector.shape_cast %0 : vector<1x1x8x128xf32> to vector<8x128xf32>
    %c0_3 = arith.constant 0 : index
    %c1 = arith.constant 1 : index
    %c0_4 = arith.constant 0 : index
    %c0_5 = arith.constant 0 : index
    %2 = vector.load %arg3[%c0_3, %c1, %c0_4, %c0_5] : memref<1x4x8x128xf32, #tpu.memory_space<vmem>>, vector<1x1x8x128xf32>
    %3 = vector.shape_cast %2 : vector<1x1x8x128xf32> to vector<8x128xf32>
    %c0_6 = arith.constant 0 : index
    %c2 = arith.constant 2 : index
    %c0_7 = arith.constant 0 : index
    %c0_8 = arith.constant 0 : index
    %4 = vector.load %arg3[%c0_6, %c2, %c0_7, %c0_8] : memref<1x4x8x128xf32, #tpu.memory_space<vmem>>, vector<1x1x8x128xf32>
    %5 = vector.shape_cast %4 : vector<1x1x8x128xf32> to vector<8x128xf32>
    %c0_9 = arith.constant 0 : index
    %c3 = arith.constant 3 : index
    %c0_10 = arith.constant 0 : index
    %c0_11 = arith.constant 0 : index
    %6 = vector.load %arg3[%c0_9, %c3, %c0_10, %c0_11] : memref<1x4x8x128xf32, #tpu.memory_space<vmem>>, vector<1x1x8x128xf32>
    %7 = vector.shape_cast %6 : vector<1x1x8x128xf32> to vector<8x128xf32>
    %c0_12 = arith.constant 0 : index
    %c0_13 = arith.constant 0 : index
    %c0_14 = arith.constant 0 : index
    %8 = memref.load %arg2[%c0_12, %c0_13, %c0_14] : memref<1x3x4xf32, #tpu.memory_space<smem>>
    %9 = vector.broadcast %8 : f32 to vector<8x128xf32>
    %10 = arith.mulf %9, %1 : vector<8x128xf32>
    %c0_15 = arith.constant 0 : index
    %c0_16 = arith.constant 0 : index
    %c1_17 = arith.constant 1 : index
    %11 = memref.load %arg2[%c0_15, %c0_16, %c1_17] : memref<1x3x4xf32, #tpu.memory_space<smem>>
    %12 = vector.broadcast %11 : f32 to vector<8x128xf32>
    %13 = arith.mulf %12, %3 : vector<8x128xf32>
    %14 = arith.addf %10, %13 : vector<8x128xf32>
    %c0_18 = arith.constant 0 : index
    %c0_19 = arith.constant 0 : index
    %c2_20 = arith.constant 2 : index
    %15 = memref.load %arg2[%c0_18, %c0_19, %c2_20] : memref<1x3x4xf32, #tpu.memory_space<smem>>
    %16 = vector.broadcast %15 : f32 to vector<8x128xf32>
    %17 = arith.mulf %16, %5 : vector<8x128xf32>
    %18 = arith.addf %14, %17 : vector<8x128xf32>
    %c0_21 = arith.constant 0 : index
    %c0_22 = arith.constant 0 : index
    %c3_23 = arith.constant 3 : index
    %19 = memref.load %arg2[%c0_21, %c0_22, %c3_23] : memref<1x3x4xf32, #tpu.memory_space<smem>>
    %20 = vector.broadcast %19 : f32 to vector<8x128xf32>
    %21 = arith.mulf %20, %7 : vector<8x128xf32>
    %22 = arith.addf %18, %21 : vector<8x128xf32>
    %c0_24 = arith.constant 0 : index
    %c1_25 = arith.constant 1 : index
    %c0_26 = arith.constant 0 : index
    %23 = memref.load %arg2[%c0_24, %c1_25, %c0_26] : memref<1x3x4xf32, #tpu.memory_space<smem>>
    %24 = vector.broadcast %23 : f32 to vector<8x128xf32>
    %25 = arith.mulf %24, %1 : vector<8x128xf32>
    %c0_27 = arith.constant 0 : index
    %c1_28 = arith.constant 1 : index
    %c1_29 = arith.constant 1 : index
    %26 = memref.load %arg2[%c0_27, %c1_28, %c1_29] : memref<1x3x4xf32, #tpu.memory_space<smem>>
    %27 = vector.broadcast %26 : f32 to vector<8x128xf32>
    %28 = arith.mulf %27, %3 : vector<8x128xf32>
    %29 = arith.addf %25, %28 : vector<8x128xf32>
    %c0_30 = arith.constant 0 : index
    %c1_31 = arith.constant 1 : index
    %c2_32 = arith.constant 2 : index
    %30 = memref.load %arg2[%c0_30, %c1_31, %c2_32] : memref<1x3x4xf32, #tpu.memory_space<smem>>
    %31 = vector.broadcast %30 : f32 to vector<8x128xf32>
    %32 = arith.mulf %31, %5 : vector<8x128xf32>
    %33 = arith.addf %29, %32 : vector<8x128xf32>
    %c0_33 = arith.constant 0 : index
    %c1_34 = arith.constant 1 : index
    %c3_35 = arith.constant 3 : index
    %34 = memref.load %arg2[%c0_33, %c1_34, %c3_35] : memref<1x3x4xf32, #tpu.memory_space<smem>>
    %35 = vector.broadcast %34 : f32 to vector<8x128xf32>
    %36 = arith.mulf %35, %7 : vector<8x128xf32>
    %37 = arith.addf %33, %36 : vector<8x128xf32>
    %c0_36 = arith.constant 0 : index
    %c2_37 = arith.constant 2 : index
    %c0_38 = arith.constant 0 : index
    %38 = memref.load %arg2[%c0_36, %c2_37, %c0_38] : memref<1x3x4xf32, #tpu.memory_space<smem>>
    %39 = vector.broadcast %38 : f32 to vector<8x128xf32>
    %40 = arith.mulf %39, %1 : vector<8x128xf32>
    %c0_39 = arith.constant 0 : index
    %c2_40 = arith.constant 2 : index
    %c1_41 = arith.constant 1 : index
    %41 = memref.load %arg2[%c0_39, %c2_40, %c1_41] : memref<1x3x4xf32, #tpu.memory_space<smem>>
    %42 = vector.broadcast %41 : f32 to vector<8x128xf32>
    %43 = arith.mulf %42, %3 : vector<8x128xf32>
    %44 = arith.addf %40, %43 : vector<8x128xf32>
    %c0_42 = arith.constant 0 : index
    %c2_43 = arith.constant 2 : index
    %c2_44 = arith.constant 2 : index
    %45 = memref.load %arg2[%c0_42, %c2_43, %c2_44] : memref<1x3x4xf32, #tpu.memory_space<smem>>
    %46 = vector.broadcast %45 : f32 to vector<8x128xf32>
    %47 = arith.mulf %46, %5 : vector<8x128xf32>
    %48 = arith.addf %44, %47 : vector<8x128xf32>
    %c0_45 = arith.constant 0 : index
    %c2_46 = arith.constant 2 : index
    %c3_47 = arith.constant 3 : index
    %49 = memref.load %arg2[%c0_45, %c2_46, %c3_47] : memref<1x3x4xf32, #tpu.memory_space<smem>>
    %50 = vector.broadcast %49 : f32 to vector<8x128xf32>
    %51 = arith.mulf %50, %7 : vector<8x128xf32>
    %52 = arith.addf %48, %51 : vector<8x128xf32>
    %cst = arith.constant 1.000000e-07 : f32
    %53 = vector.broadcast %cst : f32 to vector<8x128xf32>
    %54 = arith.addf %52, %53 : vector<8x128xf32>
    %55 = tpu.reciprocal %54 {approx = true} : vector<8x128xf32> -> vector<8x128xf32>
    %56 = arith.mulf %54, %55 : vector<8x128xf32>
    %cst_48 = arith.constant 2.000000e+00 : f32
    %57 = vector.broadcast %cst_48 : f32 to vector<8x128xf32>
    %58 = arith.subf %57, %56 : vector<8x128xf32>
    %59 = arith.mulf %55, %58 : vector<8x128xf32>
    %60 = arith.mulf %22, %59 : vector<8x128xf32>
    %cst_49 = arith.constant 1.000000e+00 : f32
    %61 = vector.broadcast %cst_49 : f32 to vector<8x128xf32>
    %62 = arith.subf %60, %61 : vector<8x128xf32>
    %c0_50 = arith.constant 0 : index
    %c0_51 = arith.constant 0 : index
    %c0_52 = arith.constant 0 : index
    %c0_53 = arith.constant 0 : index
    %63 = vector.load %arg4[%c0_50, %c0_51, %c0_52, %c0_53] : memref<1x2x8x128xf32, #tpu.memory_space<vmem>>, vector<1x1x8x128xf32>
    %64 = vector.shape_cast %63 : vector<1x1x8x128xf32> to vector<8x128xf32>
    %65 = vector.shape_cast %62 : vector<8x128xf32> to vector<1x1x8x128xf32>
    tpu.vector_store %arg4[%c0_50, %c0_51, %c0_52, %c0_53], %65 {strides = array<i32>} : memref<1x2x8x128xf32, #tpu.memory_space<vmem>>, vector<1x1x8x128xf32>,
    %66 = arith.mulf %37, %59 : vector<8x128xf32>
    %cst_54 = arith.constant 1.000000e+00 : f32
    %67 = vector.broadcast %cst_54 : f32 to vector<8x128xf32>
    %68 = arith.subf %66, %67 : vector<8x128xf32>
    %c0_55 = arith.constant 0 : index
    %c1_56 = arith.constant 1 : index
    %c0_57 = arith.constant 0 : index
    %c0_58 = arith.constant 0 : index
    %69 = vector.load %arg4[%c0_55, %c1_56, %c0_57, %c0_58] : memref<1x2x8x128xf32, #tpu.memory_space<vmem>>, vector<1x1x8x128xf32>
    %70 = vector.shape_cast %69 : vector<1x1x8x128xf32> to vector<8x128xf32>
    %71 = vector.shape_cast %68 : vector<8x128xf32> to vector<1x1x8x128xf32>
    tpu.vector_store %arg4[%c0_55, %c1_56, %c0_57, %c0_58], %71 {strides = array<i32>} : memref<1x2x8x128xf32, #tpu.memory_space<vmem>>, vector<1x1x8x128xf32>,
    return
  }
  func.func @transform_0(%arg0: i32, %arg1: i32) -> (i32, i32, i32) {
    %c0_i32 = arith.constant 0 : i32
    %c0_i32_0 = arith.constant 0 : i32
    %c0_i32_1 = arith.constant 0 : i32
    return %arg0, %c0_i32, %c0_i32_0 : i32, i32, i32
  }
  func.func @transform_1(%arg0: i32, %arg1: i32) -> (i32, i32, i32, i32) {
    %c0_i32 = arith.constant 0 : i32
    %c0_i32_0 = arith.constant 0 : i32
    %c0_i32_1 = arith.constant 0 : i32
    return %arg0, %c0_i32, %arg1, %c0_i32_0 : i32, i32, i32, i32
  }
  func.func @transform_2(%arg0: i32, %arg1: i32) -> (i32, i32, i32, i32) {
    %c0_i32 = arith.constant 0 : i32
    %c0_i32_0 = arith.constant 0 : i32
    %c0_i32_1 = arith.constant 0 : i32
    return %arg0, %c0_i32, %arg1, %c0_i32_0 : i32, i32, i32, i32
  }
}

</mosaic_0001>

<bundles_post_ra>
// kernel: project_3d.1
= control target key start
LH: loop header
LB: loop body
LE: loop exit
PB: predicated region body
PF: predicated region fallthrough
CT: control target
= control target key end

     0   :  { %7 = vsyncpa [#allocation3], 0  ;;  %s685_s0 = inlined_call_operand.vmem [shape: f32[2,3,4], index: 0, kind: input, shape index: {}]   ;;  %s686_s1 = inlined_call_operand.vmem [shape: f32[2,4,8,128], index: 1, kind: input, shape index: {}]   ;;  %s687_s2 = inlined_call_operand.vmem [shape: f32[2,2,8,128], index: 2, kind: output, shape index: {}]  }
   0x1   :  { %9 = vsyncpa [#allocation3 + $0x1], 0  ;;  %s568_s9 = smov 0   ;;  %s570_s10 = smov 0  }
   0x2   :  { %s572_s11 = smov 0   ;;  %s574_s12 = smov 0  }
   0x3   :  { %s576_s13 = smov 0   ;;  %s578_s14 = smov 0  }
   0x4 LB: > { %s384_s15 = sadd.s32 4294967295, %s540_s14   ;;  %s27_s16 = sadd.s32 1, %s536_s13  ;;  %s540_s14 = sphi %s578_s14, %s15_s14   ;;  %s536_s13 = sphi %s576_s13, %s694_s13   ;;  %s532_s12 = sphi %s574_s12, %s693_s12   ;;  %s528_s11 = sphi %s572_s11, %s692_s11   ;;  %s524_s10 = sphi %s570_s10, %s691_s10   ;;  %s520_s9 = sphi %s568_s9, %s690_s9  }
   0x5   : > { %p29_p0 = scmp.ge.s32.totalorder %s27_s16, 2  ;;  %s34_s17 = sadd.s32 1, %s528_s11 }
   0x6   : > { %p41_p1 = scmp.ne.s32.totalorder %s528_s11, %s524_s10  ;;  %p42_p2 = scmp.eq.s32.totalorder %s540_s14, 0 }
   0x7   : > { %s696_s16 = smov (%p29_p0, %s27_s16), 0  ;;  %p47_p4 = scmp.ne.s32.totalorder %s524_s10, %s520_s9 }
   0x8   : > { %p604_p3 = por %p42_p2, %p41_p1  ;;  %s31_s19 = ssub.s32 %s536_s13, %s696_s16 }
   0x9   : > { %p48_p5 = scmp.eq.s32.totalorder %s384_s15, 0  ;;  %p32_p6 = scmp.eq.s32.totalorder %s31_s19, 0 }
   0xa   : > { %p413_p8 = scmp.lt.s32.totalorder %s540_s14, 2  ;;  %s127_s22 = sand.u32 1, %s528_s11  }
   0xb   : > { %p611_p7 = por %p48_p5, %p47_p4  ;;  %s389_s23 = sshll.u32 %s536_s13, 2 }
   0xc   : > { %s617_s21 = scalar_select %p32_p6, %s528_s11, %s34_s17  }
   0xd   : > { %s388_s24 = sshll.u32 %s127_s22, 9  ;;  %s135_s27 = scalar_lea.vmem %s685_s0, %s389_s23 }
   0xe   : > { %s137_s28 = sshll.u32 %s135_s27, 4  ;;  %p410_p9 = pnand %p413_p8, %p604_p3  ;;  %s138_s28 = int_to_ptr.vmem [resolvable:$true] %s137_s28 }
   0xf   : > { %p390_p10 = scmp.ge.s32.totalorder %s540_s14, 1  ;;  %p153_p11 = scmp.lt.s32.totalorder %s540_s14, 3 }
  0x10   : > { %s131_s29 = scalar_lea.smem [#allocation2], %s388_s24  ;;  %s128_s30 = scalar_lea.sflag [#allocation3], %s127_s22 }
  0x11   : > { %412 = dma.vmem_to_smem (!%p410_p9), %s138_s28, 64, %s131_s29, %s128_s30  }
  0x12   : > { %p154_p12 = pnand %p390_p10, %p153_p11 }
  0x13   : > { %s159_s3 = sand.u32 (!%p154_p12), 1, %s524_s10  }
  0x14   : > { %157 = sbr.rel (%p154_p12) target bundleno = 69 (0x45), region = 28  ;;  %s391_s4 = sshll.u32 (!%p154_p12), %s159_s3, 9 }
  0x15   : > { %s160_s5 = scalar_lea.sflag (!%p154_p12), [#allocation3], %s159_s3  ;;  %s629_s6 = scalar_lea.smem (!%p154_p12), [#allocation2], %s391_s4 }
  0x19   : > { %515 = dma.done.wait (%p611_p7), %s160_s5, 64  }
  0x1a   : > { %517 = vsyncadd (%p611_p7), %s160_s5, 4294967232 }
  0x1b   : > { %169 = sfence }
  0x1c   : > { %p197_p13 = scmp.lt.s32.totalorder %s532_s12, 1  ;;  %s640_s8 = sld [smem:[#allocation2 + %s391_s4]] }
  0x1d   : > { %s542_s9 = smov 1   ;;  %s543_s20 = smov 256  }
  0x1e   : > { %s698_s12 = smov (!%p197_p13, %s532_s12), 1  ;;  %s643_s15 = sld [smem:[%s629_s6 + %s542_s9]] }
  0x1f   : > { %s405_s7 = sshll.u32 %s698_s12, 5  ;;  %s250_s22 = sld [smem:[%s629_s6 + %s543_s20]] }
  0x20   : > { %s204_s19 = scalar_lea.vmem %s686_s1, %s405_s7  ;;  %s544_s23 = smov 257  }
  0x21   : > { %s253_s24 = sld [smem:[%s629_s6 + %s544_s23]]  ;;  %s545_s25 = smov 258   ;;  %v213_v0 = vld [vmem:[%s204_s19] sm:$0xff]  ;;  %v396_v1 = vld [vmem:[%s204_s19 + $0x8] sm:$0xff]  ;;  %v397_v2 = vld [vmem:[%s204_s19 + $0x10] sm:$0xff] }
  0x22   : > { %s257_s26 = sld [smem:[%s629_s6 + %s545_s25]]  ;;  %s546_s27 = smov 259   ;;  %v398_v4 = vld [vmem:[%s204_s19 + $0x18] sm:$0xff]  ;;  %v221_v13 = vstv %s640_s8 }
  0x23   : > { %s261_s28 = sld [smem:[%s629_s6 + %s546_s27]]  ;;  %s547_s29 = smov 128   ;;  %v222_v19 = vmul.f32 %v221_v13, %v213_v0 }
  0x24   : > { %s653_s30 = sld [smem:[%s629_s6 + %s547_s29]]  ;;  %s548_s3 = smov 129   ;;  %v224_v14 = vstv %s643_s15 }
  0x25   : > { %s238_s4 = sld [smem:[%s629_s6 + %s548_s3]]  ;;  %v251_v3 = vstv %s250_s22  ;;  %s549_s5 = smov 2   ;;  %v225_v20 = vmul.f32 %v396_v1, %v224_v14 }
  0x26   : > { %s227_s7 = sld [smem:[%s629_s6 + %s549_s5]]  ;;  %v252_v5 = vmul.f32 %v251_v3, %v213_v0  ;;  %s550_s9 = smov 130  }
  0x27   : > { %v254_v6 = vstv %s253_s24  ;;  %s242_s17 = sld [smem:[%s629_s6 + %s550_s9]]  ;;  %s551_s18 = smov 3   ;;  %v226_v26 = vadd.f32 %v225_v20, %v222_v19 }
  0x28   : > { %v255_v7 = vmul.f32 %v396_v1, %v254_v6  ;;  %v258_v8 = vstv %s257_s26  ;;  %s231_s20 = sld [smem:[%s629_s6 + %s551_s18]]  ;;  %s552_s19 = smov 131  }
  0x29   : > { %v259_v9 = vmul.f32 %v397_v2, %v258_v8  ;;  %v262_v10 = vstv %s261_s28  ;;  %s246_s22 = sld [smem:[%s629_s6 + %s552_s19]]  ;;  %s406_s6 = sshll.u32 %s698_s12, 4 }
  0x2a   : > { %v256_v11 = vadd.f32 %v255_v7, %v252_v5  ;;  %v263_v12 = vmul.f32 %v398_v4, %v262_v10  ;;  %v236_v16 = vstv %s653_s30  ;;  %s212_s23 = scalar_lea.vmem %s687_s2, %s406_s6 }
  0x2b   : > { %v239_v17 = vstv %s238_s4  ;;  %v237_v21 = vmul.f32 %v236_v16, %v213_v0 }
  0x2c   : > { %v260_v15 = vadd.f32 %v259_v9, %v256_v11  ;;  %v240_v22 = vmul.f32 %v396_v1, %v239_v17  ;;  %v228_v23 = vstv %s227_s7 }
  0x2d   : > { %v243_v25 = vstv %s242_s17  ;;  %v229_v27 = vmul.f32 %v397_v2, %v228_v23 }
  0x2e   : > { %v264_v18 = vadd.f32 %v263_v12, %v260_v15  ;;  %v241_v28 = vadd.f32 %v240_v22, %v237_v21  ;;  %v244_v29 = vmul.f32 %v397_v2, %v243_v25  ;;  %v232_v30 = vstv %s231_s20 }
  0x2f   : > { %v247_v31 = vstv %s246_s22  ;;  %v230_v32 = vadd.f32 %v229_v27, %v226_v26  ;;  %v233_v33 = vmul.f32 %v398_v4, %v232_v30 }
  0x30   : > { %v265_v24 = vadd.f32 1e-07, %v264_v18  ;;  %v245_v34 = vadd.f32 %v244_v29, %v241_v28  ;;  %v248_v35 = vmul.f32 %v398_v4, %v247_v31 }
  0x31   : > { %v234_v38 = vadd.f32 %v233_v33, %v230_v32 }
  0x32   : > { %473 = vrcp.f32 %v265_v24  ;;  %v249_v40 = vadd.f32 %v248_v35, %v245_v34 }
  0x38   : > { %v474_v36 = vpop.eup %473 }
  0x39   : > { %v267_v37 = vmul.f32 %v474_v36, %v265_v24 }
  0x3b   : > { %v268_v39 = vsub.f32 2.0, %v267_v37 }
  0x3d   : > { %v269_v41 = vmul.f32 %v474_v36, %v268_v39 }
  0x3f   : > { %v270_v42 = vmul.f32 %v269_v41, %v234_v38  ;;  %v273_v43 = vmul.f32 %v269_v41, %v249_v40 }
  0x41   : > { %v400_v44 = vadd.f32 -1.0, %v270_v42  ;;  %v401_v45 = vadd.f32 -1.0, %v273_v43 }
  0x43   : > { %272 = vst [vmem:[%s212_s23] sm:$0xff] %v400_v44 }
  0x44   : > { %402 = vst [vmem:[%s212_s23 + $0x8] sm:$0xff] %v401_v45 }
  0x45 PF: > { %s15_s14 = sadd.s32 1, %s540_s14   ;;  %s690_s9 = smov %s524_s10 }
  0x46   : > { %p12_p0 = scmp.ge.s32.totalorder %s15_s14, 4   ;;  %s691_s10 = smov %s528_s11 }
  0x47   : > { %s692_s11 = smov %s617_s21  ;;  %s693_s12 = smov %s536_s13 }
  0x48   : > { %s694_s13 = smov %s696_s16  ;;  %14 = sbr.rel (!%p12_p0) target bundleno = 4 (0x4), region = 75 }
  0x4d   :  { %304 = vsyncpa [#allocation3], 1 }
  0x4e   :  { %306 = vsyncpa [#allocation3 + $0x1], 1 }

</bundles_post_ra>
